<compile_context>
chip_gen: v5e
topology: v5e:2x2
jax: 0.10.0
libtpu: 0.0.40
codegen_flags: <defaults>
</compile_context>

<pallas_src>
import jax
import jax.numpy as jnp
from jax.experimental import pallas as pl
from jax.experimental.pallas import tpu as pltpu

IN_F = 10    # input_layer  in_features
HID_F = 5    # input_layer  out_features / hidden_layer in_features
OUT_F = 2    # hidden_layer out_features


def _round_up(n: int, m: int) -> int:
    return ((n + m - 1) // m) * m


def fc_nn_kernel(x_ref, p1_ref, p2_ref, out_ref):
    # x_ref: (TILE_B, 10) bf16 block of the batch.
    # p1_ref: (11, 5)  = [W1^T ; b1]  (resident, constant index_map)
    # p2_ref: (6, 2)   = [W2^T ; b2]  (resident, constant index_map)
    x = x_ref[...]                                       # (TB, 10) bf16
    p1 = p1_ref[...]                                     # (11, 5)  bf16
    p2 = p2_ref[...].astype(jnp.float32)                 # (6, 2)   f32

    w1 = p1[:IN_F, :]                                    # (10, 5) bf16
    b1 = p1[IN_F:IN_F + 1, :].astype(jnp.float32)        # (1, 5)  f32
    w2 = p2[:HID_F, :]                                   # (5, 2)  f32
    b2 = p2[HID_F:HID_F + 1, :]                          # (1, 2)  f32

    # Layer 1 (bf16 MXU matmul, f32 accumulation) + bias + ReLU in f32.
    h = jnp.dot(x, w1, preferred_element_type=jnp.float32) + b1
    h = jnp.maximum(h, 0.0)
    # Layer 2 (f32; compute is hidden under DMA, precision is free here).
    y = jnp.dot(h, w2, preferred_element_type=jnp.float32) + b2
    out_ref[...] = y.astype(out_ref.dtype)


def fc_nn_forward(x, w1_t, b1, w2_t, b2, *, tile_b=2048,
                  param_dtype=jnp.bfloat16, out_dtype=jnp.float32):
    """x: (B, 10). w1_t: (10, 5), b1: (5,), w2_t: (5, 2), b2: (2,).

    Weights are stored pre-transposed as (in, out) so y = x @ W + b matches
    PyTorch nn.Linear semantics.
    """
    B, in_f = x.shape
    assert in_f == IN_F

    # Fuse each layer's weight + bias into one small resident parameter tile.
    p1 = jnp.concatenate(
        [w1_t, jnp.asarray(b1).reshape(1, HID_F)], axis=0).astype(param_dtype)   # (11, 5)
    p2 = jnp.concatenate(
        [w2_t, jnp.asarray(b2).reshape(1, OUT_F)], axis=0).astype(param_dtype)   # (6, 2)

    # Tile size: multiple of 16 (bf16 sublane packing); cap at the padded batch.
    tb = _round_up(min(tile_b, _round_up(B, 16)), 16)
    b_pad = _round_up(B, tb)

    x_in = x.astype(param_dtype)
    if b_pad != B:
        x_in = jnp.pad(x_in, ((0, b_pad - B), (0, 0)))

    grid = (b_pad // tb,)
    out = pl.pallas_call(
        fc_nn_kernel,
        out_shape=jax.ShapeDtypeStruct((b_pad, OUT_F), out_dtype),
        grid_spec=pltpu.PrefetchScalarGridSpec(
            num_scalar_prefetch=0,
            grid=grid,
            in_specs=[
                # Streamed batch tiles (double-buffered by the pipeliner).
                pl.BlockSpec((tb, IN_F), lambda i: (i, 0)),
                # Parameters: constant block index -> fetched once, VMEM-resident.
                pl.BlockSpec(p1.shape, lambda i: (0, 0)),
                pl.BlockSpec(p2.shape, lambda i: (0, 0)),
            ],
            out_specs=pl.BlockSpec((tb, OUT_F), lambda i: (i, 0)),
        ),
        compiler_params=pltpu.CompilerParams(
            # Batch axis is embarrassingly parallel -> 2x on v7x dual-TC.
            dimension_semantics=("parallel",)),
    )(x_in, p1, p2)

    return out[:B]


if __name__ == "__main__":
    key = jax.random.PRNGKey(0)
    k_x, k_w1, k_b1, k_w2, k_b2 = jax.random.split(key, 5)

    # Small, deterministic shapes; batch deliberately NOT a tile multiple so
    # the pad-and-slice path and a multi-step grid (500 -> 4 tiles of 128)
    # both get exercised.
    batch = 500
    x = jax.random.normal(k_x, (batch, IN_F), dtype=jnp.float32)
    w1_t = jax.random.normal(k_w1, (IN_F, HID_F), dtype=jnp.float32) * 0.1
    b1 = jax.random.normal(k_b1, (HID_F,), dtype=jnp.float32) * 0.1
    w2_t = jax.random.normal(k_w2, (HID_F, OUT_F), dtype=jnp.float32) * 0.1
    b2 = jax.random.normal(k_b2, (OUT_F,), dtype=jnp.float32) * 0.1

    out = fc_nn_forward(x, w1_t, b1, w2_t, b2, tile_b=128)
    jax.block_until_ready(out)
    assert out.shape == (batch, OUT_F)

    # Tight check against a reference that applies the same bf16 quantization
    # of inputs/weights the kernel uses (accumulation / bias / ReLU in f32).
    q = lambda a: a.astype(jnp.bfloat16).astype(jnp.float32)
    ref_q = jnp.maximum(q(x) @ q(w1_t) + q(b1), 0.0) @ q(w2_t) + q(b2)
    assert jnp.allclose(out, ref_q, atol=1e-3, rtol=1e-3)

    # Loose check against the full-f32 PyTorch-semantics reference
    # (tolerance widened only because of the bf16 input/weight cast).
    ref = jnp.maximum(x @ w1_t + b1, 0.0) @ w2_t + b2
    assert jnp.allclose(out, ref, atol=5e-2, rtol=5e-2)

    print("KERNEL_OK")
</pallas_src>

<mosaic_0001>
module attributes {stable_mosaic.version = 11 : i64} {
  func.func @fc_nn_kernel(%arg0: i32, %arg1: memref<128x10xbf16, #tpu.memory_space<vmem>>, %arg2: memref<11x5xbf16, #tpu.memory_space<vmem>>, %arg3: memref<6x2xbf16, #tpu.memory_space<vmem>>, %arg4: memref<128x2xf32, #tpu.memory_space<vmem>>) attributes {dimension_semantics = [#tpu.dimension_semantics<parallel>], iteration_bounds = array<i64: 4>, scalar_prefetch = 0 : i64, scratch_operands = 0 : i64, tpu.core_type = #tpu.core_type<tc>, window_params = [{transform_indices = @transform_0, window_bounds = array<i64: 128, 10>}, {pipeline_mode = #tpu.pipeline_mode<synchronous>, transform_indices = @transform_1, window_bounds = array<i64: 11, 5>}, {pipeline_mode = #tpu.pipeline_mode<synchronous>, transform_indices = @transform_2, window_bounds = array<i64: 6, 2>}, {transform_indices = @transform_3, window_bounds = array<i64: 128, 2>}]} {
    %c0 = arith.constant 0 : index
    %c0_0 = arith.constant 0 : index
    %0 = vector.load %arg1[%c0, %c0_0] : memref<128x10xbf16, #tpu.memory_space<vmem>>, vector<128x10xbf16>
    %c0_1 = arith.constant 0 : index
    %c0_2 = arith.constant 0 : index
    %1 = vector.load %arg2[%c0_1, %c0_2] : memref<11x5xbf16, #tpu.memory_space<vmem>>, vector<11x5xbf16>
    %c0_3 = arith.constant 0 : index
    %c0_4 = arith.constant 0 : index
    %2 = vector.load %arg3[%c0_3, %c0_4] : memref<6x2xbf16, #tpu.memory_space<vmem>>, vector<6x2xbf16>
    %3 = arith.extf %2 : vector<6x2xbf16> to vector<6x2xf32>
    %4 = vector.extract_strided_slice %1 {offsets = [0, 0], sizes = [10, 5], strides = [1, 1]} : vector<11x5xbf16> to vector<10x5xbf16>
    %5 = vector.extract_strided_slice %1 {offsets = [10, 0], sizes = [1, 5], strides = [1, 1]} : vector<11x5xbf16> to vector<1x5xbf16>
    %6 = arith.extf %5 : vector<1x5xbf16> to vector<1x5xf32>
    %7 = vector.extract_strided_slice %3 {offsets = [0, 0], sizes = [5, 2], strides = [1, 1]} : vector<6x2xf32> to vector<5x2xf32>
    %8 = vector.extract_strided_slice %3 {offsets = [5, 0], sizes = [1, 2], strides = [1, 1]} : vector<6x2xf32> to vector<1x2xf32>
    %cst = arith.constant dense<0.000000e+00> : vector<128x5xf32>
    %9 = tpu.matmul %0, %4, %cst {dimension_numbers = #tpu.dot_dimension_numbers<[1], [0], [0], [1], [0, 0, 1, 1], [], []>} : vector<128x10xbf16>, vector<10x5xbf16>, vector<128x5xf32> -> vector<128x5xf32>
    %10 = vector.broadcast %6 : vector<1x5xf32> to vector<128x5xf32>
    %11 = arith.addf %9, %10 : vector<128x5xf32>
    %cst_5 = arith.constant 0.000000e+00 : f32
    %12 = vector.broadcast %cst_5 : f32 to vector<128x5xf32>
    %13 = arith.maximumf %11, %12 : vector<128x5xf32>
    %cst_6 = arith.constant dense<0.000000e+00> : vector<128x2xf32>
    %14 = tpu.matmul %13, %7, %cst_6 {dimension_numbers = #tpu.dot_dimension_numbers<[1], [0], [0], [1], [0, 0, 1, 1], [], []>} : vector<128x5xf32>, vector<5x2xf32>, vector<128x2xf32> -> vector<128x2xf32>
    %15 = vector.broadcast %8 : vector<1x2xf32> to vector<128x2xf32>
    %16 = arith.addf %14, %15 : vector<128x2xf32>
    %c0_7 = arith.constant 0 : index
    %c0_8 = arith.constant 0 : index
    %17 = vector.load %arg4[%c0_7, %c0_8] : memref<128x2xf32, #tpu.memory_space<vmem>>, vector<128x2xf32>
    tpu.vector_store %arg4[%c0_7, %c0_8], %16 {strides = array<i32>} : memref<128x2xf32, #tpu.memory_space<vmem>>, vector<128x2xf32>,
    return
  }
  func.func @transform_0(%arg0: i32) -> (i32, i32) {
    %c0_i32 = arith.constant 0 : i32
    %c0_i32_0 = arith.constant 0 : i32
    return %arg0, %c0_i32 : i32, i32
  }
  func.func @transform_1(%arg0: i32) -> (i32, i32) {
    %c0_i32 = arith.constant 0 : i32
    %c0_i32_0 = arith.constant 0 : i32
    %c0_i32_1 = arith.constant 0 : i32
    return %c0_i32, %c0_i32_0 : i32, i32
  }
  func.func @transform_2(%arg0: i32) -> (i32, i32) {
    %c0_i32 = arith.constant 0 : i32
    %c0_i32_0 = arith.constant 0 : i32
    %c0_i32_1 = arith.constant 0 : i32
    return %c0_i32, %c0_i32_0 : i32, i32
  }
  func.func @transform_3(%arg0: i32) -> (i32, i32) {
    %c0_i32 = arith.constant 0 : i32
    %c0_i32_0 = arith.constant 0 : i32
    return %arg0, %c0_i32 : i32, i32
  }
}

</mosaic_0001>

<bundles_post_ra>
// kernel: tpu_custom_call.1
= control target key start
LH: loop header
LB: loop body
LE: loop exit
PB: predicated region body
PF: predicated region fallthrough
CT: control target
= control target key end

     0   :  { %s646_s12 = smov 0   ;;  %s745_s0 = inlined_call_operand.vmem [shape: bf16[512,10], index: 0, kind: input, shape index: {}]   ;;  %s746_s1 = inlined_call_operand.vmem [shape: bf16[11,5], index: 1, kind: input, shape index: {}]   ;;  %s747_s2 = inlined_call_operand.vmem [shape: bf16[6,2], index: 2, kind: input, shape index: {}]   ;;  %s748_s3 = inlined_call_operand.vmem [shape: f32[512,2], index: 3, kind: output, shape index: {}]  }
   0x1 LB: > { %s527_s13 = sadd.s32 4294967295, %s624_s12   ;;  %p531_p0 = scmp.ge.s32.totalorder %s624_s12, 1  ;;  %s624_s12 = sphi %s646_s12, %s13_s12  }
   0x2   : > { %p138_p1 = scmp.lt.s32.totalorder %s624_s12, 5 }
   0x4   : > { %p139_p2 = pnand %p531_p0, %p138_p1 }
   0x5   : > { %s532_s18 = sshll.u32 (!%p139_p2), %s527_s13, 4 }
   0x6   : > { %142 = sbr.rel (%p139_p2) target bundleno = 345 (0x159), region = 32  ;;  %p163_p3 = scmp.lt.s32.totalorder (!%p139_p2), %s532_s18, 63 }
   0xb   : > { %v570_v0 = vld [vmem:[%s746_s1] sm:$0xf]  ;;  %v607_v1 = vld [vmem:[%s746_s1] sm:$0x30]  ;;  %vm267_vm0 = vcmask 1044480   ;;  %s750_s18 = smov (!%p163_p3, %s532_s18), 63 }
   0xc   : > { %v571_v2 = vor.u32 %v607_v1, %v570_v0  ;;  %s533_s19 = sshll.u32 %s750_s18, 2  ;;  %vm242_vm1 = vcmask 80896   ;;  %v193_v12 = vld [vmem:[%s747_s2] sm:$0x7]  ;;  %v192_v14 = vld [vmem:[%s746_s1 + $0x4] sm:$0x3] }
   0xd   : > { %s166_s22 = scalar_lea.vmem %s745_s0, %s533_s19  ;;  %v678_v13 = vunpack.c.l.bf16 %v193_v12  ;;  %v195_v15 = vunpack.c.l.bf16 %v192_v14  ;;  %vm337_vm2 = vcmask 39936   ;;  %s535_s27 = sshll.u32 %s750_s18, 3  ;;  %vm454_vm3 = vcmask 15360  }
   0xe   : > { %v269_v3 = vsel %vm267_vm0, %v571_v2, 0  ;;  %v599_v4 = vld [vmem:[%s166_s22] sm:$0xff]  ;;  %v600_v6 = vld [vmem:[%s166_s22 + $0x8] sm:$0xff]  ;;  %v601_v8 = vld [vmem:[%s166_s22 + $0x10] sm:$0xff]  ;;  %s708_s30 = scalar_lea.vmem %s748_s3, %s535_s27 }
   0xf   : > { %278 = vmatpush.bf16.msra.mxu0 %v269_v3  ;;  %608 = vmatpush.bf16.msra.mxu2 %v269_v3  ;;  %v603_v5 = vld [vmem:[%s166_s22 + $0x20] sm:$0xff]  ;;  %v604_v7 = vld [vmem:[%s166_s22 + $0x28] sm:$0xff]  ;;  %v605_v9 = vld [vmem:[%s166_s22 + $0x30] sm:$0xff]  ;;  %v196_v16 = vperm.slane %v195_v15, 2  ;;  %v336_v1 = vperm.slane %v678_v13, 5 }
  0x10   : > { %v602_v10 = vld [vmem:[%s166_s22 + $0x18] sm:$0xff]  ;;  %580 = vmatpush.msk.msra.mxu1 %vm267_vm0, %v678_v13  ;;  %609 = vmatpush.msk.msra.mxu3 %vm267_vm0, %v678_v13 }
  0x11   : > { %v606_v11 = vld [vmem:[%s166_s22 + $0x38] sm:$0xff] }
  0x12   : > { %572 = vmatmul.msk.bf16.vlgmr.msra.gmra.mxu0 %vm242_vm1, %v599_v4  ;;  %576 = vmatmul.msk.bf16.vlgmr.msra.gmra.mxu2 %vm242_vm1, %v603_v5 }
  0x22   : > { %573 = vmatmul.msk.bf16.gmra.mxu0 %vm242_vm1, %v600_v6  ;;  %577 = vmatmul.msk.bf16.gmra.mxu2 %vm242_vm1, %v604_v7 }
  0x32   : > { %574 = vmatmul.msk.bf16.gmra.mxu0 %vm242_vm1, %v601_v8  ;;  %578 = vmatmul.msk.bf16.gmra.mxu2 %vm242_vm1, %v605_v9 }
  0x42   : > { %575 = vmatmul.msk.bf16.gmra.mxu0 %vm242_vm1, %v602_v10  ;;  %579 = vmatmul.msk.bf16.gmra.mxu2 %vm242_vm1, %v606_v11 }
  0x8f   : > { %v280_v17 = vpop.f32.mrf.mxu0 }
  0x90   : > { %v281_v18 = vadd.f32 %v280_v17, %v196_v16 }
  0x92   : > { %v320_v19 = vmax.f32 %v281_v18, 0.0 }
  0x94   : > { %581 = vmatmul.msk.f32.vlgmr.msra.gmra.mxu1 %vm337_vm2, %v320_v19 }
  0x95   : > { %v300_v20 = vpop.f32.mrf.mxu2 }
  0x96   : > { %v301_v61 = vadd.f32 %v300_v20, %v196_v16 }
  0x97   : > { %v282_v21 = vpop.f32.mrf.mxu0 }
  0x98   : > { %v283_v22 = vadd.f32 %v282_v21, %v196_v16  ;;  %v328_v0 = vmax.f32 %v301_v61, 0.0 }
  0x9a   : > { %v321_v23 = vmax.f32 %v283_v22, 0.0 }
  0x9c   : > { %582 = vmatmul.msk.f32.gmra.mxu1 %vm337_vm2, %v321_v23 }
  0x9d   : > { %v302_v24 = vpop.f32.mrf.mxu2 }
  0x9e   : > { %v303_v25 = vadd.f32 %v302_v24, %v196_v16 }
  0x9f   : > { %v285_v26 = vpop.f32.mrf.mxu0 }
  0xa0   : > { %v329_v27 = vmax.f32 %v303_v25, 0.0  ;;  %v286_v28 = vadd.f32 %v285_v26, %v196_v16 }
  0xa2   : > { %v322_v29 = vmax.f32 %v286_v28, 0.0  ;;  %590 = vmatmul.msk.f32.vlgmr.msra.gmra.mxu3 %vm337_vm2, %v329_v27 }
  0xa4   : > { %583 = vmatmul.msk.f32.gmra.mxu1 %vm337_vm2, %v322_v29 }
  0xa5   : > { %v305_v30 = vpop.f32.mrf.mxu2 }
  0xa6   : > { %v306_v31 = vadd.f32 %v305_v30, %v196_v16 }
  0xa7   : > { %v287_v32 = vpop.f32.mrf.mxu0 }
  0xa8   : > { %v330_v33 = vmax.f32 %v306_v31, 0.0  ;;  %v288_v34 = vadd.f32 %v287_v32, %v196_v16 }
  0xaa   : > { %v323_v35 = vmax.f32 %v288_v34, 0.0  ;;  %591 = vmatmul.msk.f32.gmra.mxu3 %vm337_vm2, %v330_v33 }
  0xac   : > { %584 = vmatmul.msk.f32.gmra.mxu1 %vm337_vm2, %v323_v35 }
  0xad   : > { %v307_v36 = vpop.f32.mrf.mxu2 }
  0xae   : > { %v308_v37 = vadd.f32 %v307_v36, %v196_v16 }
  0xaf   : > { %v290_v38 = vpop.f32.mrf.mxu0 }
  0xb0   : > { %v331_v39 = vmax.f32 %v308_v37, 0.0  ;;  %v291_v40 = vadd.f32 %v290_v38, %v196_v16 }
  0xb2   : > { %v324_v41 = vmax.f32 %v291_v40, 0.0  ;;  %592 = vmatmul.msk.f32.gmra.mxu3 %vm337_vm2, %v331_v39 }
  0xb4   : > { %585 = vmatmul.msk.f32.gmra.mxu1 %vm337_vm2, %v324_v41 }
  0xb5   : > { %v310_v42 = vpop.f32.mrf.mxu2 }
  0xb6   : > { %v311_v43 = vadd.f32 %v310_v42, %v196_v16 }
  0xb7   : > { %v292_v44 = vpop.f32.mrf.mxu0 }
  0xb8   : > { %v332_v45 = vmax.f32 %v311_v43, 0.0  ;;  %v293_v46 = vadd.f32 %v292_v44, %v196_v16 }
  0xba   : > { %v325_v47 = vmax.f32 %v293_v46, 0.0  ;;  %593 = vmatmul.msk.f32.gmra.mxu3 %vm337_vm2, %v332_v45 }
  0xbc   : > { %586 = vmatmul.msk.f32.gmra.mxu1 %vm337_vm2, %v325_v47 }
  0xbd   : > { %v312_v48 = vpop.f32.mrf.mxu2 }
  0xbe   : > { %v313_v49 = vadd.f32 %v312_v48, %v196_v16 }
  0xbf   : > { %v295_v50 = vpop.f32.mrf.mxu0 }
  0xc0   : > { %v333_v51 = vmax.f32 %v313_v49, 0.0  ;;  %v296_v52 = vadd.f32 %v295_v50, %v196_v16 }
  0xc2   : > { %v326_v53 = vmax.f32 %v296_v52, 0.0  ;;  %594 = vmatmul.msk.f32.gmra.mxu3 %vm337_vm2, %v333_v51 }
  0xc4   : > { %587 = vmatmul.msk.f32.gmra.mxu1 %vm337_vm2, %v326_v53 }
  0xc5   : > { %v315_v54 = vpop.f32.mrf.mxu2 }
  0xc6   : > { %v316_v55 = vadd.f32 %v315_v54, %v196_v16 }
  0xc7   : > { %v297_v56 = vpop.f32.mrf.mxu0 }
  0xc8   : > { %v334_v57 = vmax.f32 %v316_v55, 0.0  ;;  %v298_v58 = vadd.f32 %v297_v56, %v196_v16 }
  0xca   : > { %v327_v59 = vmax.f32 %v298_v58, 0.0  ;;  %595 = vmatmul.msk.f32.gmra.mxu3 %vm337_vm2, %v334_v57 }
  0xcc   : > { %588 = vmatmul.msk.f32.gmra.mxu1 %vm337_vm2, %v327_v59 }
  0xcd   : > { %v317_v60 = vpop.f32.mrf.mxu2 }
  0xce   : > { %v318_v62 = vadd.f32 %v317_v60, %v196_v16 }
  0xd0   : > { %v335_v63 = vmax.f32 %v318_v62, 0.0 }
  0xd2   : > { %596 = vmatmul.msk.f32.gmra.mxu3 %vm337_vm2, %v335_v63 }
  0xd4   : > { %589 = vmatmul.msk.f32.gmra.mxu1 %vm337_vm2, %v328_v0 }
 0x111   : > { %v406_v2 = vpop.f32.mrf.mxu1 }
 0x112   : > { %v407_v3 = vadd.f32 %v406_v2, %v336_v1 }
 0x114   : > { %455 = vst.msk [vmem:[%s708_s30] sm:$0xff] %vm454_vm3, %v407_v3 }
 0x119   : > { %v409_v4 = vpop.f32.mrf.mxu1 }
 0x11a   : > { %v410_v5 = vadd.f32 %v409_v4, %v336_v1 }
 0x11c   : > { %456 = vst.msk [vmem:[%s708_s30 + $0x8] sm:$0xff] %vm454_vm3, %v410_v5 }
 0x121   : > { %v412_v6 = vpop.f32.mrf.mxu1 }
 0x122   : > { %v413_v7 = vadd.f32 %v412_v6, %v336_v1 }
 0x124   : > { %457 = vst.msk [vmem:[%s708_s30 + $0x10] sm:$0xff] %vm454_vm3, %v413_v7 }
 0x125   : > { %v433_v8 = vpop.f32.mrf.mxu3 }
 0x126   : > { %v434_v9 = vadd.f32 %v433_v8, %v336_v1 }
 0x128   : > { %464 = vst.msk [vmem:[%s708_s30 + $0x48] sm:$0xff] %vm454_vm3, %v434_v9 }
 0x129   : > { %v415_v10 = vpop.f32.mrf.mxu1 }
 0x12a   : > { %v416_v11 = vadd.f32 %v415_v10, %v336_v1 }
 0x12c   : > { %458 = vst.msk [vmem:[%s708_s30 + $0x18] sm:$0xff] %vm454_vm3, %v416_v11 }
 0x12d   : > { %v436_v12 = vpop.f32.mrf.mxu3 }
 0x12e   : > { %v437_v13 = vadd.f32 %v436_v12, %v336_v1 }
 0x130   : > { %465 = vst.msk [vmem:[%s708_s30 + $0x50] sm:$0xff] %vm454_vm3, %v437_v13 }
 0x131   : > { %v418_v14 = vpop.f32.mrf.mxu1 }
 0x132   : > { %v419_v15 = vadd.f32 %v418_v14, %v336_v1 }
 0x134   : > { %459 = vst.msk [vmem:[%s708_s30 + $0x20] sm:$0xff] %vm454_vm3, %v419_v15 }
 0x135   : > { %v439_v16 = vpop.f32.mrf.mxu3 }
 0x136   : > { %v440_v17 = vadd.f32 %v439_v16, %v336_v1 }
 0x138   : > { %466 = vst.msk [vmem:[%s708_s30 + $0x58] sm:$0xff] %vm454_vm3, %v440_v17 }
 0x139   : > { %v421_v18 = vpop.f32.mrf.mxu1 }
 0x13a   : > { %v422_v19 = vadd.f32 %v421_v18, %v336_v1 }
 0x13c   : > { %460 = vst.msk [vmem:[%s708_s30 + $0x28] sm:$0xff] %vm454_vm3, %v422_v19 }
 0x13d   : > { %v442_v20 = vpop.f32.mrf.mxu3 }
 0x13e   : > { %v443_v21 = vadd.f32 %v442_v20, %v336_v1 }
 0x140   : > { %467 = vst.msk [vmem:[%s708_s30 + $0x60] sm:$0xff] %vm454_vm3, %v443_v21 }
 0x141   : > { %v424_v22 = vpop.f32.mrf.mxu1 }
 0x142   : > { %v425_v23 = vadd.f32 %v424_v22, %v336_v1 }
 0x144   : > { %461 = vst.msk [vmem:[%s708_s30 + $0x30] sm:$0xff] %vm454_vm3, %v425_v23 }
 0x145   : > { %v445_v24 = vpop.f32.mrf.mxu3 }
 0x146   : > { %v446_v25 = vadd.f32 %v445_v24, %v336_v1 }
 0x148   : > { %468 = vst.msk [vmem:[%s708_s30 + $0x68] sm:$0xff] %vm454_vm3, %v446_v25 }
 0x149   : > { %v427_v26 = vpop.f32.mrf.mxu1 }
 0x14a   : > { %v428_v27 = vadd.f32 %v427_v26, %v336_v1 }
 0x14c   : > { %462 = vst.msk [vmem:[%s708_s30 + $0x38] sm:$0xff] %vm454_vm3, %v428_v27 }
 0x14d   : > { %v448_v28 = vpop.f32.mrf.mxu3 }
 0x14e   : > { %v449_v29 = vadd.f32 %v448_v28, %v336_v1 }
 0x150   : > { %469 = vst.msk [vmem:[%s708_s30 + $0x70] sm:$0xff] %vm454_vm3, %v449_v29 }
 0x151   : > { %v430_v30 = vpop.f32.mrf.mxu1 }
 0x152   : > { %v431_v31 = vadd.f32 %v430_v30, %v336_v1 }
 0x154   : > { %463 = vst.msk [vmem:[%s708_s30 + $0x40] sm:$0xff] %vm454_vm3, %v431_v31 }
 0x155   : > { %v451_v32 = vpop.f32.mrf.mxu3 }
 0x156   : > { %v452_v33 = vadd.f32 %v451_v32, %v336_v1 }
 0x158   : > { %470 = vst.msk [vmem:[%s708_s30 + $0x78] sm:$0xff] %vm454_vm3, %v452_v33 }
 0x159 PF: > { %s13_s12 = sadd.s32 1, %s624_s12  }
 0x15a   : > { %p10_p4 = scmp.ge.s32.totalorder %s13_s12, 6  }
 0x15c   :  { %12 = sbr.rel (!%p10_p4) target bundleno = 1 (0x1), region = 62 }

</bundles_post_ra>
